<compile_context>
chip_gen: v5e
topology: v5e:2x2
jax: 0.10.0
libtpu: 0.0.40
codegen_flags: <defaults>
</compile_context>

<pallas_src>
import functools

import jax
import jax.numpy as jnp
from jax.experimental import pallas as pl
from jax.experimental.pallas import tpu as pltpu


# ----------------------------------------------------------------------------
# Constant builders (analogous to the module's registered buffers).
# ----------------------------------------------------------------------------

def _round_up(x: int, m: int) -> int:
    return (x + m - 1) // m * m


def _hz_to_mel(f):
    return 2595.0 * jnp.log10(1.0 + f / 700.0)          # HTK


def _mel_to_hz(m):
    return 700.0 * (10.0 ** (m / 2595.0) - 1.0)


def _mel_filterbank(sample_rate: int, n_fft: int, f_min: float, f_max: float,
                    n_mels: int) -> jnp.ndarray:
    """torchaudio.functional.melscale_fbanks (htk scale, norm=None)."""
    n_freq = n_fft // 2 + 1
    all_freqs = jnp.linspace(0.0, sample_rate // 2, n_freq)
    m_pts = jnp.linspace(_hz_to_mel(jnp.float32(f_min)),
                         _hz_to_mel(jnp.float32(f_max)), n_mels + 2)
    f_pts = _mel_to_hz(m_pts)                            # (n_mels + 2,)
    f_diff = f_pts[1:] - f_pts[:-1]                      # (n_mels + 1,)
    slopes = f_pts[None, :] - all_freqs[:, None]         # (n_freq, n_mels + 2)
    down = (-slopes[:, :-2]) / f_diff[:-1]
    up = slopes[:, 2:] / f_diff[1:]
    fb = jnp.maximum(0.0, jnp.minimum(down, up))         # (n_freq, n_mels)
    return fb.astype(jnp.float32)


def _windowed_dft_bases(n_fft: int):
    """Real-DFT cos/sin bases with the periodic Hann window folded in."""
    n_freq = n_fft // 2 + 1
    n = jnp.arange(n_fft, dtype=jnp.int32)
    k = jnp.arange(n_freq, dtype=jnp.int32)
    # Reduce n*k mod n_fft BEFORE converting to float so the angle stays small
    # and cos/sin keep full f32 accuracy.
    nk = (n[:, None] * k[None, :]) % n_fft               # (n_fft, n_freq)
    ang = (2.0 * jnp.pi / n_fft) * nk.astype(jnp.float32)
    window = 0.5 - 0.5 * jnp.cos(
        2.0 * jnp.pi * jnp.arange(n_fft, dtype=jnp.float32) / n_fft)
    cos_b = (window[:, None] * jnp.cos(ang)).astype(jnp.float32)
    sin_b = (window[:, None] * jnp.sin(ang)).astype(jnp.float32)
    return cos_b, sin_b


# ----------------------------------------------------------------------------
# Pallas kernel: windowed DFT (2 matmuls) -> power -> mel matmul -> clamp+log.
# ----------------------------------------------------------------------------

def _logmel_kernel(frames_ref, cos_ref, sin_ref, fb_ref, out_ref):
    x = frames_ref[...]                                               # (Rt, n_fft)
    re = jnp.dot(x, cos_ref[...], preferred_element_type=jnp.float32)  # (Rt, n_freq)
    im = jnp.dot(x, sin_ref[...], preferred_element_type=jnp.float32)
    power = re * re + im * im                                          # |X|^2
    mel = jnp.dot(power, fb_ref[...], preferred_element_type=jnp.float32)
    out_ref[...] = jnp.log(jnp.maximum(mel, 1e-6))                     # (Rt, n_mels)


_DEFAULT_ROW_TILE = 512  # rows (frames) per grid step for large inputs


def log_mel_spectrogram(x, *, sample_rate: int, n_fft: int, hop_length: int,
                        f_min: float, n_mels: int):
    """x: (B, L) waveform.  Returns (B, n_mels, T) log-mel, torchaudio layout."""
    x = x.astype(jnp.float32)
    B, L = x.shape
    n_freq = n_fft // 2 + 1
    T = 1 + L // hop_length
    pad = n_fft // 2

    # center=True reflect padding + overlapped framing (gather in the wrapper).
    xp = jnp.pad(x, ((0, 0), (pad, pad)), mode="reflect")
    starts = jnp.arange(T, dtype=jnp.int32) * hop_length
    idx = starts[:, None] + jnp.arange(n_fft, dtype=jnp.int32)[None, :]
    frames = xp[:, idx]                                   # (B, T, n_fft)

    # Fold batch & time into one row axis -> big lane-dense tiles.
    rows = B * T
    frames2 = frames.reshape(rows, n_fft)
    if rows <= _DEFAULT_ROW_TILE:
        row_tile = _round_up(rows, 8)
    else:
        row_tile = _DEFAULT_ROW_TILE
    rows_pad = _round_up(rows, row_tile)
    if rows_pad != rows:
        frames2 = jnp.pad(frames2, ((0, rows_pad - rows), (0, 0)))

    cos_b, sin_b = _windowed_dft_bases(n_fft)             # (n_fft, n_freq)
    fb = _mel_filterbank(sample_rate, n_fft, f_min, sample_rate / 2.0, n_mels)

    out2 = pl.pallas_call(
        _logmel_kernel,
        grid=(rows_pad // row_tile,),
        in_specs=[
            pl.BlockSpec((row_tile, n_fft), lambda r: (r, 0)),   # streamed frames
            pl.BlockSpec((n_fft, n_freq), lambda r: (0, 0)),     # resident cos basis
            pl.BlockSpec((n_fft, n_freq), lambda r: (0, 0)),     # resident sin basis
            pl.BlockSpec((n_freq, n_mels), lambda r: (0, 0)),    # resident mel fb
        ],
        out_specs=pl.BlockSpec((row_tile, n_mels), lambda r: (r, 0)),
        out_shape=jax.ShapeDtypeStruct((rows_pad, n_mels), jnp.float32),
        compiler_params=pltpu.CompilerParams(
            dimension_semantics=("parallel",)),
    )(frames2, cos_b, sin_b, fb)

    mel = out2[:rows].reshape(B, T, n_mels)
    return jnp.transpose(mel, (0, 2, 1))                  # (B, n_mels, T)


# ----------------------------------------------------------------------------
# Pure-JAX reference (uses jnp.fft.rfft, independent of the in-kernel DFT).
# ----------------------------------------------------------------------------

def _reference(x, sample_rate, n_fft, hop_length, f_min, n_mels):
    x = x.astype(jnp.float32)
    B, L = x.shape
    pad = n_fft // 2
    xp = jnp.pad(x, ((0, 0), (pad, pad)), mode="reflect")
    T = 1 + L // hop_length
    starts = jnp.arange(T, dtype=jnp.int32) * hop_length
    idx = starts[:, None] + jnp.arange(n_fft, dtype=jnp.int32)[None, :]
    frames = xp[:, idx]                                   # (B, T, n_fft)
    window = 0.5 - 0.5 * jnp.cos(
        2.0 * jnp.pi * jnp.arange(n_fft, dtype=jnp.float32) / n_fft)
    spec = jnp.fft.rfft(frames * window[None, None, :], axis=-1)
    power = spec.real ** 2 + spec.imag ** 2               # (B, T, n_freq)
    fb = _mel_filterbank(sample_rate, n_fft, f_min, sample_rate / 2.0, n_mels)
    mel = jnp.einsum("btf,fm->btm", power, fb,
                     precision=jax.lax.Precision.HIGHEST)
    mel = jnp.transpose(mel, (0, 2, 1))                   # (B, n_mels, T)
    return jnp.log(jnp.maximum(mel, 1e-6))


if __name__ == "__main__":
    # Small shapes consistent with the module's forward.
    sample_rate, n_fft, hop_length, f_min, n_mels = 16000, 256, 128, 0.0, 128
    batch, num_samples = 2, 1024

    key = jax.random.PRNGKey(0)
    x = jax.random.normal(key, (batch, num_samples), jnp.float32)

    run = functools.partial(log_mel_spectrogram, sample_rate=sample_rate,
                            n_fft=n_fft, hop_length=hop_length, f_min=f_min,
                            n_mels=n_mels)
    out = jax.block_until_ready(run(x))

    T = 1 + num_samples // hop_length
    assert out.shape == (batch, n_mels, T), out.shape
    assert bool(jnp.all(jnp.isfinite(out)))

    ref = _reference(x, sample_rate, n_fft, hop_length, f_min, n_mels)
    # log-domain comparison; 5e-2 absolute slack covers MXU-DFT vs XLA-FFT
    # rounding while still catching any real window/basis/filterbank bug.
    assert bool(jnp.allclose(out, ref, atol=5e-2, rtol=0.0)), "mismatch vs reference"

    print("KERNEL_OK")
</pallas_src>

<mosaic_0001>
module attributes {stable_mosaic.version = 11 : i64} {
  func.func @_logmel_kernel(%arg0: i32, %arg1: memref<24x256xf32, #tpu.memory_space<vmem>>, %arg2: memref<256x129xf32, #tpu.memory_space<vmem>>, %arg3: memref<256x129xf32, #tpu.memory_space<vmem>>, %arg4: memref<129x128xf32, #tpu.memory_space<vmem>>, %arg5: memref<24x128xf32, #tpu.memory_space<vmem>>) attributes {dimension_semantics = [#tpu.dimension_semantics<parallel>], iteration_bounds = array<i64: 1>, scalar_prefetch = 0 : i64, scratch_operands = 0 : i64, tpu.core_type = #tpu.core_type<tc>, window_params = [{transform_indices = @transform_0, window_bounds = array<i64: 24, 256>}, {pipeline_mode = #tpu.pipeline_mode<synchronous>, transform_indices = @transform_1, window_bounds = array<i64: 256, 129>}, {pipeline_mode = #tpu.pipeline_mode<synchronous>, transform_indices = @transform_2, window_bounds = array<i64: 256, 129>}, {pipeline_mode = #tpu.pipeline_mode<synchronous>, transform_indices = @transform_3, window_bounds = array<i64: 129, 128>}, {transform_indices = @transform_4, window_bounds = array<i64: 24, 128>}]} {
    %c0 = arith.constant 0 : index
    %c0_0 = arith.constant 0 : index
    %0 = vector.load %arg1[%c0, %c0_0] : memref<24x256xf32, #tpu.memory_space<vmem>>, vector<24x256xf32>
    %c0_1 = arith.constant 0 : index
    %c0_2 = arith.constant 0 : index
    %1 = vector.load %arg2[%c0_1, %c0_2] : memref<256x129xf32, #tpu.memory_space<vmem>>, vector<256x129xf32>
    %cst = arith.constant dense<0.000000e+00> : vector<24x129xf32>
    %2 = tpu.matmul %0, %1, %cst {dimension_numbers = #tpu.dot_dimension_numbers<[1], [0], [0], [1], [0, 0, 1, 1], [], []>} : vector<24x256xf32>, vector<256x129xf32>, vector<24x129xf32> -> vector<24x129xf32>
    %c0_3 = arith.constant 0 : index
    %c0_4 = arith.constant 0 : index
    %3 = vector.load %arg3[%c0_3, %c0_4] : memref<256x129xf32, #tpu.memory_space<vmem>>, vector<256x129xf32>
    %cst_5 = arith.constant dense<0.000000e+00> : vector<24x129xf32>
    %4 = tpu.matmul %0, %3, %cst_5 {dimension_numbers = #tpu.dot_dimension_numbers<[1], [0], [0], [1], [0, 0, 1, 1], [], []>} : vector<24x256xf32>, vector<256x129xf32>, vector<24x129xf32> -> vector<24x129xf32>
    %5 = arith.mulf %2, %2 : vector<24x129xf32>
    %6 = arith.mulf %4, %4 : vector<24x129xf32>
    %7 = arith.addf %5, %6 : vector<24x129xf32>
    %c0_6 = arith.constant 0 : index
    %c0_7 = arith.constant 0 : index
    %8 = vector.load %arg4[%c0_6, %c0_7] : memref<129x128xf32, #tpu.memory_space<vmem>>, vector<129x128xf32>
    %cst_8 = arith.constant dense<0.000000e+00> : vector<24x128xf32>
    %9 = tpu.matmul %7, %8, %cst_8 {dimension_numbers = #tpu.dot_dimension_numbers<[1], [0], [0], [1], [0, 0, 1, 1], [], []>} : vector<24x129xf32>, vector<129x128xf32>, vector<24x128xf32> -> vector<24x128xf32>
    %cst_9 = arith.constant 9.99999997E-7 : f32
    %10 = vector.broadcast %cst_9 : f32 to vector<24x128xf32>
    %11 = arith.maximumf %9, %10 : vector<24x128xf32>
    %12 = math.log %11 : vector<24x128xf32>
    %c0_10 = arith.constant 0 : index
    %c0_11 = arith.constant 0 : index
    %13 = vector.load %arg5[%c0_10, %c0_11] : memref<24x128xf32, #tpu.memory_space<vmem>>, vector<24x128xf32>
    tpu.vector_store %arg5[%c0_10, %c0_11], %12 {strides = array<i32>} : memref<24x128xf32, #tpu.memory_space<vmem>>, vector<24x128xf32>,
    return
  }
  func.func @transform_0(%arg0: i32) -> (i32, i32) {
    %c0_i32 = arith.constant 0 : i32
    %c0_i32_0 = arith.constant 0 : i32
    return %arg0, %c0_i32 : i32, i32
  }
  func.func @transform_1(%arg0: i32) -> (i32, i32) {
    %c0_i32 = arith.constant 0 : i32
    %c0_i32_0 = arith.constant 0 : i32
    %c0_i32_1 = arith.constant 0 : i32
    return %c0_i32, %c0_i32_0 : i32, i32
  }
  func.func @transform_2(%arg0: i32) -> (i32, i32) {
    %c0_i32 = arith.constant 0 : i32
    %c0_i32_0 = arith.constant 0 : i32
    %c0_i32_1 = arith.constant 0 : i32
    return %c0_i32, %c0_i32_0 : i32, i32
  }
  func.func @transform_3(%arg0: i32) -> (i32, i32) {
    %c0_i32 = arith.constant 0 : i32
    %c0_i32_0 = arith.constant 0 : i32
    %c0_i32_1 = arith.constant 0 : i32
    return %c0_i32, %c0_i32_0 : i32, i32
  }
  func.func @transform_4(%arg0: i32) -> (i32, i32) {
    %c0_i32 = arith.constant 0 : i32
    %c0_i32_0 = arith.constant 0 : i32
    return %arg0, %c0_i32 : i32, i32
  }
}

</mosaic_0001>

<bundles_post_ra>
// kernel: tpu_custom_call.1
= control target key start
LH: loop header
LB: loop body
LE: loop exit
PB: predicated region body
PF: predicated region fallthrough
CT: control target
= control target key end

     0   :  { %s1058_s0 = inlined_call_operand.vmem [shape: f32[24,256], index: 0, kind: input, shape index: {}]   ;;  %s1059_s1 = inlined_call_operand.vmem [shape: f32[256,129], index: 1, kind: input, shape index: {}]   ;;  %s1060_s2 = inlined_call_operand.vmem [shape: f32[256,129], index: 2, kind: input, shape index: {}]   ;;  %s1061_s3 = inlined_call_operand.vmem [shape: f32[129,128], index: 3, kind: input, shape index: {}]   ;;  %s1062_s4 = inlined_call_operand.hbm [shape: f32[24,128], index: 4, kind: output, shape index: {}]  }
   0x1   :  { %v54_v0 = vld [vmem:[%s1059_s1 + $0xf0] sm:$0xff]  ;;  %v55_v2 = vld [vmem:[%s1059_s1 + $0xf8] sm:$0xff]  ;;  %v52_v4 = vld [vmem:[%s1059_s1 + $0xe0] sm:$0xff] }
   0x2   :  { %v86_v1 = vld [vmem:[%s1059_s1 + $0x1f0] sm:$0xff]  ;;  %88 = vmatpush.msra.mxu0 %v54_v0  ;;  %v87_v3 = vld [vmem:[%s1059_s1 + $0x1f8] sm:$0xff]  ;;  %v84_v5 = vld [vmem:[%s1059_s1 + $0x1e0] sm:$0xff]  ;;  %140 = vmatpush.msra.mxu2 %v55_v2 }
   0x3   :  { %114 = vmatpush.msra.mxu1 %v86_v1  ;;  %166 = vmatpush.msra.mxu3 %v87_v3  ;;  %v53_v6 = vld [vmem:[%s1059_s1 + $0xe8] sm:$0xff]  ;;  %v50_v8 = vld [vmem:[%s1059_s1 + $0xd0] sm:$0xff]  ;;  %v51_v10 = vld [vmem:[%s1059_s1 + $0xd8] sm:$0xff] }
   0x4   :  { %v85_v7 = vld [vmem:[%s1059_s1 + $0x1e8] sm:$0xff]  ;;  %89 = vmatpush.msra.mxu0 %v52_v4  ;;  %v82_v9 = vld [vmem:[%s1059_s1 + $0x1d0] sm:$0xff]  ;;  %v83_v11 = vld [vmem:[%s1059_s1 + $0x1d8] sm:$0xff]  ;;  %141 = vmatpush.msra.mxu2 %v53_v6 }
   0x5   :  { %115 = vmatpush.msra.mxu1 %v84_v5  ;;  %167 = vmatpush.msra.mxu3 %v85_v7  ;;  %v48_v12 = vld [vmem:[%s1059_s1 + $0xc0] sm:$0xff]  ;;  %v49_v14 = vld [vmem:[%s1059_s1 + $0xc8] sm:$0xff]  ;;  %v46_v16 = vld [vmem:[%s1059_s1 + $0xb0] sm:$0xff] }
   0x6   :  { %v80_v13 = vld [vmem:[%s1059_s1 + $0x1c0] sm:$0xff]  ;;  %90 = vmatpush.msra.mxu0 %v50_v8  ;;  %v81_v15 = vld [vmem:[%s1059_s1 + $0x1c8] sm:$0xff]  ;;  %142 = vmatpush.msra.mxu2 %v51_v10  ;;  %v78_v17 = vld [vmem:[%s1059_s1 + $0x1b0] sm:$0xff] }
   0x7   :  { %116 = vmatpush.msra.mxu1 %v82_v9  ;;  %168 = vmatpush.msra.mxu3 %v83_v11  ;;  %v47_v18 = vld [vmem:[%s1059_s1 + $0xb8] sm:$0xff]  ;;  %v44_v20 = vld [vmem:[%s1059_s1 + $0xa0] sm:$0xff]  ;;  %v45_v22 = vld [vmem:[%s1059_s1 + $0xa8] sm:$0xff] }
   0x8   :  { %91 = vmatpush.msra.mxu0 %v48_v12  ;;  %v79_v19 = vld [vmem:[%s1059_s1 + $0x1b8] sm:$0xff]  ;;  %143 = vmatpush.msra.mxu2 %v49_v14  ;;  %v76_v21 = vld [vmem:[%s1059_s1 + $0x1a0] sm:$0xff]  ;;  %v77_v23 = vld [vmem:[%s1059_s1 + $0x1a8] sm:$0xff] }
   0x9   :  { %117 = vmatpush.msra.mxu1 %v80_v13  ;;  %169 = vmatpush.msra.mxu3 %v81_v15  ;;  %v42_v24 = vld [vmem:[%s1059_s1 + $0x90] sm:$0xff]  ;;  %v43_v26 = vld [vmem:[%s1059_s1 + $0x98] sm:$0xff]  ;;  %v40_v28 = vld [vmem:[%s1059_s1 + $0x80] sm:$0xff] }
   0xa   :  { %92 = vmatpush.msra.mxu0 %v46_v16  ;;  %144 = vmatpush.msra.mxu2 %v47_v18  ;;  %v74_v25 = vld [vmem:[%s1059_s1 + $0x190] sm:$0xff]  ;;  %v75_v27 = vld [vmem:[%s1059_s1 + $0x198] sm:$0xff]  ;;  %v72_v29 = vld [vmem:[%s1059_s1 + $0x180] sm:$0xff] }
   0xb   :  { %118 = vmatpush.msra.mxu1 %v78_v17  ;;  %170 = vmatpush.msra.mxu3 %v79_v19  ;;  %v41_v30 = vld [vmem:[%s1059_s1 + $0x88] sm:$0xff]  ;;  %v38_v32 = vld [vmem:[%s1059_s1 + $0x70] sm:$0xff]  ;;  %v39_v34 = vld [vmem:[%s1059_s1 + $0x78] sm:$0xff] }
   0xc   :  { %93 = vmatpush.msra.mxu0 %v44_v20  ;;  %145 = vmatpush.msra.mxu2 %v45_v22  ;;  %v73_v31 = vld [vmem:[%s1059_s1 + $0x188] sm:$0xff]  ;;  %v70_v33 = vld [vmem:[%s1059_s1 + $0x170] sm:$0xff]  ;;  %v71_v35 = vld [vmem:[%s1059_s1 + $0x178] sm:$0xff] }
   0xd   :  { %119 = vmatpush.msra.mxu1 %v76_v21  ;;  %171 = vmatpush.msra.mxu3 %v77_v23  ;;  %v36_v36 = vld [vmem:[%s1059_s1 + $0x60] sm:$0xff]  ;;  %v37_v38 = vld [vmem:[%s1059_s1 + $0x68] sm:$0xff]  ;;  %v34_v40 = vld [vmem:[%s1059_s1 + $0x50] sm:$0xff] }
   0xe   :  { %94 = vmatpush.msra.mxu0 %v42_v24  ;;  %146 = vmatpush.msra.mxu2 %v43_v26  ;;  %v68_v37 = vld [vmem:[%s1059_s1 + $0x160] sm:$0xff]  ;;  %v69_v39 = vld [vmem:[%s1059_s1 + $0x168] sm:$0xff]  ;;  %v66_v41 = vld [vmem:[%s1059_s1 + $0x150] sm:$0xff] }
   0xf   :  { %120 = vmatpush.msra.mxu1 %v74_v25  ;;  %172 = vmatpush.msra.mxu3 %v75_v27  ;;  %v35_v42 = vld [vmem:[%s1059_s1 + $0x58] sm:$0xff]  ;;  %v32_v44 = vld [vmem:[%s1059_s1 + $0x40] sm:$0xff]  ;;  %v33_v46 = vld [vmem:[%s1059_s1 + $0x48] sm:$0xff] }
  0x10   :  { %95 = vmatpush.msra.mxu0 %v40_v28  ;;  %147 = vmatpush.msra.mxu2 %v41_v30  ;;  %v67_v43 = vld [vmem:[%s1059_s1 + $0x158] sm:$0xff]  ;;  %v64_v45 = vld [vmem:[%s1059_s1 + $0x140] sm:$0xff]  ;;  %v65_v47 = vld [vmem:[%s1059_s1 + $0x148] sm:$0xff] }
  0x11   :  { %121 = vmatpush.msra.mxu1 %v72_v29  ;;  %173 = vmatpush.msra.mxu3 %v73_v31  ;;  %v30_v48 = vld [vmem:[%s1059_s1 + $0x30] sm:$0xff]  ;;  %v31_v50 = vld [vmem:[%s1059_s1 + $0x38] sm:$0xff]  ;;  %v28_v52 = vld [vmem:[%s1059_s1 + $0x20] sm:$0xff] }
  0x12   :  { %96 = vmatpush.msra.mxu0 %v38_v32  ;;  %148 = vmatpush.msra.mxu2 %v39_v34  ;;  %v62_v49 = vld [vmem:[%s1059_s1 + $0x130] sm:$0xff]  ;;  %v63_v51 = vld [vmem:[%s1059_s1 + $0x138] sm:$0xff]  ;;  %v60_v53 = vld [vmem:[%s1059_s1 + $0x120] sm:$0xff] }
  0x13   :  { %122 = vmatpush.msra.mxu1 %v70_v33  ;;  %174 = vmatpush.msra.mxu3 %v71_v35  ;;  %v29_v54 = vld [vmem:[%s1059_s1 + $0x28] sm:$0xff]  ;;  %v26_v56 = vld [vmem:[%s1059_s1 + $0x10] sm:$0xff]  ;;  %v27_v58 = vld [vmem:[%s1059_s1 + $0x18] sm:$0xff] }
  0x14   :  { %97 = vmatpush.msra.mxu0 %v36_v36  ;;  %149 = vmatpush.msra.mxu2 %v37_v38  ;;  %v61_v55 = vld [vmem:[%s1059_s1 + $0x128] sm:$0xff]  ;;  %v58_v57 = vld [vmem:[%s1059_s1 + $0x110] sm:$0xff]  ;;  %v59_v59 = vld [vmem:[%s1059_s1 + $0x118] sm:$0xff] }
  0x15   :  { %123 = vmatpush.msra.mxu1 %v68_v37  ;;  %175 = vmatpush.msra.mxu3 %v69_v39  ;;  %v24_v60 = vld [vmem:[%s1059_s1] sm:$0xff]  ;;  %v25_v62 = vld [vmem:[%s1059_s1 + $0x8] sm:$0xff]  ;;  %v222_v0 = vld [vmem:[%s1060_s2 + $0xf0] sm:$0xff] }
  0x16   :  { %98 = vmatpush.msra.mxu0 %v34_v40  ;;  %150 = vmatpush.msra.mxu2 %v35_v42  ;;  %v56_v61 = vld [vmem:[%s1059_s1 + $0x100] sm:$0xff]  ;;  %v57_v63 = vld [vmem:[%s1059_s1 + $0x108] sm:$0xff]  ;;  %v254_v1 = vld [vmem:[%s1060_s2 + $0x1f0] sm:$0xff] }
  0x17   :  { %124 = vmatpush.msra.mxu1 %v66_v41  ;;  %176 = vmatpush.msra.mxu3 %v67_v43  ;;  %v223_v2 = vld [vmem:[%s1060_s2 + $0xf8] sm:$0xff]  ;;  %v220_v4 = vld [vmem:[%s1060_s2 + $0xe0] sm:$0xff]  ;;  %v221_v6 = vld [vmem:[%s1060_s2 + $0xe8] sm:$0xff] }
  0x18   :  { %99 = vmatpush.msra.mxu0 %v32_v44  ;;  %151 = vmatpush.msra.mxu2 %v33_v46  ;;  %v255_v3 = vld [vmem:[%s1060_s2 + $0x1f8] sm:$0xff]  ;;  %v252_v5 = vld [vmem:[%s1060_s2 + $0x1e0] sm:$0xff]  ;;  %v253_v7 = vld [vmem:[%s1060_s2 + $0x1e8] sm:$0xff] }
  0x19   :  { %125 = vmatpush.msra.mxu1 %v64_v45  ;;  %177 = vmatpush.msra.mxu3 %v65_v47  ;;  %v218_v8 = vld [vmem:[%s1060_s2 + $0xd0] sm:$0xff]  ;;  %v219_v10 = vld [vmem:[%s1060_s2 + $0xd8] sm:$0xff]  ;;  %v216_v12 = vld [vmem:[%s1060_s2 + $0xc0] sm:$0xff] }
  0x1a   :  { %100 = vmatpush.msra.mxu0 %v30_v48  ;;  %152 = vmatpush.msra.mxu2 %v31_v50  ;;  %v250_v9 = vld [vmem:[%s1060_s2 + $0x1d0] sm:$0xff]  ;;  %v251_v11 = vld [vmem:[%s1060_s2 + $0x1d8] sm:$0xff]  ;;  %v248_v13 = vld [vmem:[%s1060_s2 + $0x1c0] sm:$0xff] }
  0x1b   :  { %126 = vmatpush.msra.mxu1 %v62_v49  ;;  %178 = vmatpush.msra.mxu3 %v63_v51  ;;  %v217_v14 = vld [vmem:[%s1060_s2 + $0xc8] sm:$0xff]  ;;  %v818_v16 = vld [vmem:[%s1058_s0] sm:$0xff]  ;;  %v214_v18 = vld [vmem:[%s1060_s2 + $0xb0] sm:$0xff] }
  0x1c   :  { %101 = vmatpush.msra.mxu0 %v28_v52  ;;  %153 = vmatpush.msra.mxu2 %v29_v54  ;;  %v249_v15 = vld [vmem:[%s1060_s2 + $0x1c8] sm:$0xff]  ;;  %v246_v19 = vld [vmem:[%s1060_s2 + $0x1b0] sm:$0xff]  ;;  %v215_v20 = vld [vmem:[%s1060_s2 + $0xb8] sm:$0xff] }
  0x1d   :  { %127 = vmatpush.msra.mxu1 %v60_v53  ;;  %179 = vmatpush.msra.mxu3 %v61_v55  ;;  %v823_v17 = vld [vmem:[%s1058_s0 + $0x8] sm:$0xff]  ;;  %v247_v21 = vld [vmem:[%s1060_s2 + $0x1b8] sm:$0xff]  ;;  %v212_v22 = vld [vmem:[%s1060_s2 + $0xa0] sm:$0xff] }
  0x1e   :  { %102 = vmatpush.msra.mxu0 %v26_v56  ;;  %154 = vmatpush.msra.mxu2 %v27_v58  ;;  %v244_v23 = vld [vmem:[%s1060_s2 + $0x1a0] sm:$0xff]  ;;  %v213_v24 = vld [vmem:[%s1060_s2 + $0xa8] sm:$0xff]  ;;  %v210_v26 = vld [vmem:[%s1060_s2 + $0x90] sm:$0xff] }
  0x1f   :  { %128 = vmatpush.msra.mxu1 %v58_v57  ;;  %180 = vmatpush.msra.mxu3 %v59_v59  ;;  %v245_v25 = vld [vmem:[%s1060_s2 + $0x1a8] sm:$0xff]  ;;  %v242_v27 = vld [vmem:[%s1060_s2 + $0x190] sm:$0xff] }
  0x20   :  { %103 = vmatpush.msra.mxu0 %v24_v60  ;;  %155 = vmatpush.msra.mxu2 %v25_v62 }
  0x21   :  { %129 = vmatpush.msra.mxu1 %v56_v61  ;;  %181 = vmatpush.msra.mxu3 %v57_v63 }
  0x22   :  { %256 = vmatpush.msrb.mxu0 %v222_v0  ;;  %308 = vmatpush.msrb.mxu2 %v223_v2 }
  0x23   :  { %282 = vmatpush.msrb.mxu1 %v254_v1  ;;  %334 = vmatpush.msrb.mxu3 %v255_v3 }
  0x24   :  { %257 = vmatpush.msrb.mxu0 %v220_v4  ;;  %309 = vmatpush.msrb.mxu2 %v221_v6 }
  0x25   :  { %283 = vmatpush.msrb.mxu1 %v252_v5  ;;  %335 = vmatpush.msrb.mxu3 %v253_v7 }
  0x26   :  { %258 = vmatpush.msrb.mxu0 %v218_v8  ;;  %310 = vmatpush.msrb.mxu2 %v219_v10 }
  0x27   :  { %284 = vmatpush.msrb.mxu1 %v250_v9  ;;  %336 = vmatpush.msrb.mxu3 %v251_v11 }
  0x28   :  { %259 = vmatpush.msrb.mxu0 %v216_v12  ;;  %311 = vmatpush.msrb.mxu2 %v217_v14 }
  0x29   :  { %285 = vmatpush.msrb.mxu1 %v248_v13  ;;  %337 = vmatpush.msrb.mxu3 %v249_v15 }
  0x2a   :  { %104 = vmatmul.f32.vlgmr.msra.gmra.mxu0 %v818_v16  ;;  %130 = vmatmul.f32.vlgmr.msra.gmra.mxu1 %v823_v17 }
  0x2b   :  { %156 = vmatmul.f32.vlgmr.msra.gmra.mxu2 %v818_v16  ;;  %182 = vmatmul.f32.vlgmr.msra.gmra.mxu3 %v823_v17 }
  0x2c   :  { %260 = vmatpush.msrb.mxu0 %v214_v18  ;;  %286 = vmatpush.msrb.mxu1 %v246_v19 }
  0x2d   :  { %312 = vmatpush.msrb.mxu2 %v215_v20  ;;  %338 = vmatpush.msrb.mxu3 %v247_v21 }
  0x2e   :  { %9 = vsyncpa [#allocation3], 0  ;;  %261 = vmatpush.msrb.mxu0 %v212_v22  ;;  %287 = vmatpush.msrb.mxu1 %v244_v23  ;;  %v211_v28 = vld [vmem:[%s1060_s2 + $0x98] sm:$0xff]  ;;  %v208_v30 = vld [vmem:[%s1060_s2 + $0x80] sm:$0xff]  ;;  %vm405_vm0 = vcmask 1040384   ;;  %vm395_vm1 = vcmask 7168  }
  0x2f   :  { %v243_v29 = vld [vmem:[%s1060_s2 + $0x198] sm:$0xff]  ;;  %313 = vmatpush.msrb.mxu2 %v213_v24  ;;  %339 = vmatpush.msrb.mxu3 %v245_v25  ;;  %v240_v31 = vld [vmem:[%s1060_s2 + $0x180] sm:$0xff]  ;;  %v209_v32 = vld [vmem:[%s1060_s2 + $0x88] sm:$0xff]  ;;  %s479_s22 = sshll.u32 %s1062_s4, 4  ;;  %s548_s23 = smov 128   ;;  %s480_s22 = int_to_ptr.hbm [resolvable:$true] %s479_s22 }
  0x30   :  { %262 = vmatpush.msrb.mxu0 %v210_v26  ;;  %288 = vmatpush.msrb.mxu1 %v242_v27  ;;  %v241_v33 = vld [vmem:[%s1060_s2 + $0x188] sm:$0xff]  ;;  %v880_v34 = vld [vmem:[%s1058_s0 + $0x10] sm:$0xff]  ;;  %v885_v35 = vld [vmem:[%s1058_s0 + $0x18] sm:$0xff]  ;;  %s549_s24 = smov 8  }
  0x31   :  { %314 = vmatpush.msrb.mxu2 %v211_v28  ;;  %340 = vmatpush.msrb.mxu3 %v243_v29  ;;  %v206_v36 = vld [vmem:[%s1060_s2 + $0x70] sm:$0xff]  ;;  %v207_v38 = vld [vmem:[%s1060_s2 + $0x78] sm:$0xff]  ;;  %v204_v40 = vld [vmem:[%s1060_s2 + $0x60] sm:$0xff] }
  0x32   :  { %263 = vmatpush.msrb.mxu0 %v208_v30  ;;  %289 = vmatpush.msrb.mxu1 %v240_v31  ;;  %v238_v37 = vld [vmem:[%s1060_s2 + $0x170] sm:$0xff]  ;;  %v239_v39 = vld [vmem:[%s1060_s2 + $0x178] sm:$0xff]  ;;  %v236_v41 = vld [vmem:[%s1060_s2 + $0x160] sm:$0xff] }
  0x33   :  { %315 = vmatpush.msrb.mxu2 %v209_v32  ;;  %341 = vmatpush.msrb.mxu3 %v241_v33  ;;  %v205_v42 = vld [vmem:[%s1060_s2 + $0x68] sm:$0xff]  ;;  %v202_v44 = vld [vmem:[%s1060_s2 + $0x50] sm:$0xff]  ;;  %v203_v46 = vld [vmem:[%s1060_s2 + $0x58] sm:$0xff] }
  0x34   :  { %107 = vmatmul.f32.gmra.mxu0 %v880_v34  ;;  %133 = vmatmul.f32.gmra.mxu1 %v885_v35  ;;  %v237_v43 = vld [vmem:[%s1060_s2 + $0x168] sm:$0xff]  ;;  %v234_v45 = vld [vmem:[%s1060_s2 + $0x150] sm:$0xff]  ;;  %v235_v47 = vld [vmem:[%s1060_s2 + $0x158] sm:$0xff] }
  0x35   :  { %159 = vmatmul.f32.gmra.mxu2 %v880_v34  ;;  %185 = vmatmul.f32.gmra.mxu3 %v885_v35  ;;  %v200_v48 = vld [vmem:[%s1060_s2 + $0x40] sm:$0xff]  ;;  %v201_v50 = vld [vmem:[%s1060_s2 + $0x48] sm:$0xff]  ;;  %v198_v54 = vld [vmem:[%s1060_s2 + $0x30] sm:$0xff] }
  0x36   :  { %264 = vmatpush.msrb.mxu0 %v206_v36  ;;  %290 = vmatpush.msrb.mxu1 %v238_v37  ;;  %v232_v49 = vld [vmem:[%s1060_s2 + $0x140] sm:$0xff]  ;;  %v233_v51 = vld [vmem:[%s1060_s2 + $0x148] sm:$0xff]  ;;  %v230_v55 = vld [vmem:[%s1060_s2 + $0x130] sm:$0xff] }
  0x37   :  { %316 = vmatpush.msrb.mxu2 %v207_v38  ;;  %342 = vmatpush.msrb.mxu3 %v239_v39  ;;  %v22_v52 = vld [vmem:[%s1058_s0 + $0x20] sm:$0xff]  ;;  %v23_v53 = vld [vmem:[%s1058_s0 + $0x28] sm:$0xff]  ;;  %v199_v56 = vld [vmem:[%s1060_s2 + $0x38] sm:$0xff] }
  0x38   :  { %265 = vmatpush.msrb.mxu0 %v204_v40  ;;  %291 = vmatpush.msrb.mxu1 %v236_v41  ;;  %v231_v57 = vld [vmem:[%s1060_s2 + $0x138] sm:$0xff]  ;;  %v196_v58 = vld [vmem:[%s1060_s2 + $0x20] sm:$0xff]  ;;  %v197_v60 = vld [vmem:[%s1060_s2 + $0x28] sm:$0xff] }
  0x39   :  { %317 = vmatpush.msrb.mxu2 %v205_v42  ;;  %343 = vmatpush.msrb.mxu3 %v237_v43  ;;  %v228_v59 = vld [vmem:[%s1060_s2 + $0x120] sm:$0xff]  ;;  %v229_v61 = vld [vmem:[%s1060_s2 + $0x128] sm:$0xff]  ;;  %v194_v62 = vld [vmem:[%s1060_s2 + $0x10] sm:$0xff] }
  0x3a   :  { %266 = vmatpush.msrb.mxu0 %v202_v44  ;;  %292 = vmatpush.msrb.mxu1 %v234_v45  ;;  %v226_v63 = vld [vmem:[%s1060_s2 + $0x110] sm:$0xff]  ;;  %v195_v0 = vld [vmem:[%s1060_s2 + $0x18] sm:$0xff]  ;;  %v192_v2 = vld [vmem:[%s1060_s2] sm:$0xff] }
  0x3b   :  { %318 = vmatpush.msrb.mxu2 %v203_v46  ;;  %344 = vmatpush.msrb.mxu3 %v235_v47  ;;  %v227_v1 = vld [vmem:[%s1060_s2 + $0x118] sm:$0xff]  ;;  %v224_v3 = vld [vmem:[%s1060_s2 + $0x100] sm:$0xff]  ;;  %v193_v4 = vld [vmem:[%s1060_s2 + $0x8] sm:$0xff] }
  0x3c   :  { %267 = vmatpush.msrb.mxu0 %v200_v48  ;;  %293 = vmatpush.msrb.mxu1 %v232_v49  ;;  %v225_v5 = vld [vmem:[%s1060_s2 + $0x108] sm:$0xff]  ;;  %v393_v6 = vld [vmem:[%s1061_s3 + $0x78] sm:$0xff]  ;;  %v392_v7 = vld [vmem:[%s1061_s3 + $0x70] sm:$0xff] }
  0x3d   :  { %319 = vmatpush.msrb.mxu2 %v201_v50  ;;  %345 = vmatpush.msrb.mxu3 %v233_v51  ;;  %v391_v8 = vld [vmem:[%s1061_s3 + $0x68] sm:$0xff]  ;;  %v390_v9 = vld [vmem:[%s1061_s3 + $0x60] sm:$0xff]  ;;  %v389_v10 = vld [vmem:[%s1061_s3 + $0x58] sm:$0xff] }
  0x3e   :  { %110 = vmatmul.f32.gmra.mxu0 %v22_v52  ;;  %136 = vmatmul.f32.gmra.mxu1 %v23_v53  ;;  %v388_v11 = vld [vmem:[%s1061_s3 + $0x50] sm:$0xff]  ;;  %v387_v12 = vld [vmem:[%s1061_s3 + $0x48] sm:$0xff]  ;;  %v386_v13 = vld [vmem:[%s1061_s3 + $0x40] sm:$0xff] }
  0x3f   :  { %162 = vmatmul.f32.gmra.mxu2 %v22_v52  ;;  %188 = vmatmul.f32.gmra.mxu3 %v23_v53  ;;  %v385_v14 = vld [vmem:[%s1061_s3 + $0x38] sm:$0xff]  ;;  %v384_v15 = vld [vmem:[%s1061_s3 + $0x30] sm:$0xff]  ;;  %v382_v18 = vld [vmem:[%s1061_s3 + $0x20] sm:$0xff] }
  0x40   :  { %268 = vmatpush.msrb.mxu0 %v198_v54  ;;  %294 = vmatpush.msrb.mxu1 %v230_v55  ;;  %v381_v19 = vld [vmem:[%s1061_s3 + $0x18] sm:$0xff]  ;;  %v380_v22 = vld [vmem:[%s1061_s3 + $0x10] sm:$0xff]  ;;  %v379_v23 = vld [vmem:[%s1061_s3 + $0x8] sm:$0xff] }
  0x41   :  { %320 = vmatpush.msrb.mxu2 %v199_v56  ;;  %346 = vmatpush.msrb.mxu3 %v231_v57  ;;  %v378_v24 = vld [vmem:[%s1061_s3] sm:$0xff] }
  0x42   :  { %269 = vmatpush.msrb.mxu0 %v196_v58  ;;  %295 = vmatpush.msrb.mxu1 %v228_v59 }
  0x43   :  { %321 = vmatpush.msrb.mxu2 %v197_v60  ;;  %347 = vmatpush.msrb.mxu3 %v229_v61 }
  0x44   :  { %270 = vmatpush.msrb.mxu0 %v194_v62  ;;  %296 = vmatpush.msrb.mxu1 %v226_v63 }
  0x45   :  { %322 = vmatpush.msrb.mxu2 %v195_v0  ;;  %348 = vmatpush.msrb.mxu3 %v227_v1 }
  0x46   :  { %271 = vmatpush.msrb.mxu0 %v192_v2  ;;  %297 = vmatpush.msrb.mxu1 %v224_v3 }
  0x47   :  { %323 = vmatpush.msrb.mxu2 %v193_v4  ;;  %349 = vmatpush.msrb.mxu3 %v225_v5 }
  0x48   :  { %272 = vmatmul.f32.vlgmr.msrb.gmra.mxu0 %v818_v16  ;;  %298 = vmatmul.f32.vlgmr.msrb.gmra.mxu1 %v823_v17 }
  0x49   :  { %324 = vmatmul.f32.vlgmr.msrb.gmra.mxu2 %v818_v16  ;;  %350 = vmatmul.f32.vlgmr.msrb.gmra.mxu3 %v823_v17  ;;  %v394_v16 = vld [vmem:[%s1061_s3 + $0x80] sm:$0x1]  ;;  %v383_v17 = vld [vmem:[%s1061_s3 + $0x28] sm:$0xff]  ;;  %s547_s3 = smov [#allocation2]  }
  0x4a   :  { %409 = vmatpush.msra.mxu0 %v393_v6  ;;  %495 = vmatpush.msra.mxu2 %v393_v6  ;;  %s477_s20 = sshll.u32 %s547_s3, 4  ;;  %s478_s20 = int_to_ptr.vmem [resolvable:$true] %s477_s20 }
  0x4b   :  { %511 = vmatpush.msk.msra.mxu3 %vm405_vm0, %v394_v16  ;;  %491 = vmatpush.msk.msra.mxu1 %vm405_vm0, %v394_v16 }
  0x4c   :  { %410 = vmatpush.msra.mxu0 %v392_v7  ;;  %496 = vmatpush.msra.mxu2 %v392_v7 }
  0x4e   :  { %411 = vmatpush.msra.mxu0 %v391_v8  ;;  %497 = vmatpush.msra.mxu2 %v391_v8 }
  0x50   :  { %275 = vmatmul.f32.gmra.mxu0 %v880_v34  ;;  %301 = vmatmul.f32.gmra.mxu1 %v885_v35 }
  0x51   :  { %327 = vmatmul.f32.gmra.mxu2 %v880_v34  ;;  %353 = vmatmul.f32.gmra.mxu3 %v885_v35 }
  0x52   :  { %412 = vmatpush.msra.mxu0 %v390_v9  ;;  %498 = vmatpush.msra.mxu2 %v390_v9 }
  0x54   :  { %413 = vmatpush.msra.mxu0 %v389_v10  ;;  %499 = vmatpush.msra.mxu2 %v389_v10 }
  0x56   :  { %414 = vmatpush.msra.mxu0 %v388_v11  ;;  %500 = vmatpush.msra.mxu2 %v388_v11 }
  0x58   :  { %278 = vmatmul.f32.gmra.mxu0 %v22_v52  ;;  %304 = vmatmul.f32.gmra.mxu1 %v23_v53 }
  0x59   :  { %330 = vmatmul.f32.gmra.mxu2 %v22_v52  ;;  %356 = vmatmul.f32.gmra.mxu3 %v23_v53 }
  0x5a   :  { %415 = vmatpush.msra.mxu0 %v387_v12  ;;  %501 = vmatpush.msra.mxu2 %v387_v12 }
  0x5c   :  { %416 = vmatpush.msra.mxu0 %v386_v13  ;;  %502 = vmatpush.msra.mxu2 %v386_v13 }
  0x5e   :  { %417 = vmatpush.msra.mxu0 %v385_v14  ;;  %503 = vmatpush.msra.mxu2 %v385_v14 }
  0x60   :  { %418 = vmatpush.msra.mxu0 %v384_v15  ;;  %504 = vmatpush.msra.mxu2 %v384_v15 }
  0x62   :  { %419 = vmatpush.msra.mxu0 %v383_v17  ;;  %505 = vmatpush.msra.mxu2 %v383_v17 }
  0x64   :  { %420 = vmatpush.msra.mxu0 %v382_v18  ;;  %506 = vmatpush.msra.mxu2 %v382_v18 }
  0x66   :  { %421 = vmatpush.msra.mxu0 %v381_v19  ;;  %507 = vmatpush.msra.mxu2 %v381_v19 }
  0x68   :  { %422 = vmatpush.msra.mxu0 %v380_v22  ;;  %508 = vmatpush.msra.mxu2 %v380_v22 }
  0x6a   :  { %423 = vmatpush.msra.mxu0 %v379_v23  ;;  %509 = vmatpush.msra.mxu2 %v379_v23 }
  0x6c   :  { %424 = vmatpush.msra.mxu0 %v378_v24  ;;  %510 = vmatpush.msra.mxu2 %v378_v24 }
  0xa7   :  { %v105_v20 = vpop.f32.mrf.mxu0  ;;  %v131_v21 = vpop.f32.mrf.mxu1 }
  0xa8   :  { %v132_v35 = vadd.f32 %v131_v21, %v105_v20 }
  0xaa   :  { %v360_v39 = vmul.f32 %v132_v35, %v132_v35 }
  0xae   :  { %v157_v25 = vpop.f32.mrf.mxu2  ;;  %v183_v26 = vpop.f32.mrf.mxu3 }
  0xaf   :  { %v184_v42 = vadd.f32 %v183_v26, %v157_v25 }
  0xb1   :  { %v108_v27 = vpop.f32.mrf.mxu0  ;;  %v134_v28 = vpop.f32.mrf.mxu1  ;;  %v361_v50 = vmul.f32 %v184_v42, %v184_v42 }
  0xb2   :  { %v135_v43 = vadd.f32 %v134_v28, %v108_v27 }
  0xb4   :  { %v362_v52 = vmul.f32 %v135_v43, %v135_v43 }
  0xb8   :  { %v160_v29 = vpop.f32.mrf.mxu2  ;;  %v186_v30 = vpop.f32.mrf.mxu3 }
  0xb9   :  { %v187_v56 = vadd.f32 %v186_v30, %v160_v29 }
  0xbb   :  { %v111_v31 = vpop.f32.mrf.mxu0  ;;  %v137_v32 = vpop.f32.mrf.mxu1  ;;  %v363_v0 = vmul.f32 %v187_v56, %v187_v56 }
  0xbc   :  { %v138_v57 = vadd.f32 %v137_v32, %v111_v31 }
  0xbe   :  { %v364_v2 = vmul.f32 %v138_v57, %v138_v57 }
  0xc2   :  { %v163_v33 = vpop.f32.mrf.mxu2  ;;  %v189_v34 = vpop.f32.mrf.mxu3 }
  0xc3   :  { %v190_v6 = vadd.f32 %v189_v34, %v163_v33 }
  0xc5   :  { %v273_v36 = vpop.f32.mrf.mxu0  ;;  %v299_v37 = vpop.f32.mrf.mxu1  ;;  %v365_v10 = vmul.f32 %v190_v6, %v190_v6 }
  0xc6   :  { %v300_v38 = vadd.f32 %v299_v37, %v273_v36 }
  0xc8   :  { %v366_v40 = vmul.f32 %v300_v38, %v300_v38 }
  0xca   :  { %v372_v41 = vadd.f32 %v366_v40, %v360_v39 }
  0xcc   :  { %v325_v44 = vpop.f32.mrf.mxu2  ;;  %v351_v45 = vpop.f32.mrf.mxu3  ;;  %425 = vmatmul.f32.vlgmr.msra.gmra.mxu0 %v372_v41 }
  0xcd   :  { %v352_v46 = vadd.f32 %v351_v45, %v325_v44  ;;  %v276_v47 = vpop.f32.mrf.mxu0  ;;  %v302_v48 = vpop.f32.mrf.mxu1 }
  0xce   :  { %v303_v49 = vadd.f32 %v302_v48, %v276_v47 }
  0xcf   :  { %v367_v51 = vmul.f32 %v352_v46, %v352_v46 }
  0xd0   :  { %v368_v53 = vmul.f32 %v303_v49, %v303_v49 }
  0xd1   :  { %v373_v54 = vadd.f32 %v367_v51, %v361_v50 }
  0xd2   :  { %v374_v55 = vadd.f32 %v368_v53, %v362_v52 }
  0xd3   :  { %492 = vmatmul.msk.f32.vlgmr.msra.gmra.mxu1 %vm395_vm1, %v373_v54 }
  0xd4   :  { %v328_v58 = vpop.f32.mrf.mxu2  ;;  %v354_v59 = vpop.f32.mrf.mxu3  ;;  %428 = vmatmul.f32.vlgmr.msra.gmra.mxu2 %v374_v55 }
  0xd5   :  { %v355_v60 = vadd.f32 %v354_v59, %v328_v58  ;;  %v279_v61 = vpop.f32.mrf.mxu0  ;;  %v305_v62 = vpop.f32.mrf.mxu1 }
  0xd6   :  { %v306_v63 = vadd.f32 %v305_v62, %v279_v61 }
  0xd7   :  { %v369_v1 = vmul.f32 %v355_v60, %v355_v60 }
  0xd8   :  { %v370_v3 = vmul.f32 %v306_v63, %v306_v63 }
  0xd9   :  { %v375_v4 = vadd.f32 %v369_v1, %v363_v0 }
  0xda   :  { %v376_v5 = vadd.f32 %v370_v3, %v364_v2 }
  0xdb   :  { %493 = vmatmul.msk.f32.vlgmr.msra.gmra.mxu3 %vm395_vm1, %v375_v4 }
  0xdc   :  { %v331_v7 = vpop.f32.mrf.mxu2  ;;  %v357_v8 = vpop.f32.mrf.mxu3  ;;  %431 = vmatmul.f32.gmra.mxu2 %v376_v5 }
  0xdd   :  { %v358_v9 = vadd.f32 %v357_v8, %v331_v7 }
  0xdf   :  { %v371_v11 = vmul.f32 %v358_v9, %v358_v9 }
  0xe1   :  { %v377_v12 = vadd.f32 %v371_v11, %v365_v10 }
  0xe3   :  { %494 = vmatmul.msk.f32.gmra.mxu3 %vm395_vm1, %v377_v12 }
 0x149   :  { %v426_v13 = vpop.f32.mrf.mxu0 }
 0x150   :  { %v452_v14 = vpop.f32.mrf.mxu1 }
 0x151   :  { %v453_v15 = vadd.f32 %v452_v14, %v426_v13 }
 0x153   :  { %v461_v16 = vmax.f32 %v453_v15, 1e-06 }
 0x155   :  { %515 = vlog2.f32 %v461_v16 }
 0x157   :  { %v429_v19 = vpop.f32.mrf.mxu2 }
 0x15b   :  { %v516_v17 = vpop.eup %515 }
 0x15c   :  { %v465_v18 = vmul.f32 0.6931472, %v516_v17 }
 0x15e   :  { %470 = vst [vmem:[#allocation2] sm:$0xff] %v465_v18  ;;  %v455_v20 = vpop.f32.mrf.mxu3 }
 0x15f   :  { %v456_v21 = vadd.f32 %v455_v20, %v429_v19  ;;  %v432_v23 = vpop.f32.mrf.mxu2 }
 0x161   :  { %v462_v22 = vmax.f32 %v456_v21, 1e-06 }
 0x163   :  { %517 = vlog2.f32 %v462_v22 }
 0x166   :  { %v458_v24 = vpop.f32.mrf.mxu3 }
 0x167   :  { %v459_v25 = vadd.f32 %v458_v24, %v432_v23 }
 0x169   :  { %v518_v26 = vpop.eup %517  ;;  %v463_v27 = vmax.f32 %v459_v25, 1e-06 }
 0x16a   :  { %v467_v28 = vmul.f32 0.6931472, %v518_v26 }
 0x16b   :  { %519 = vlog2.f32 %v463_v27 }
 0x16c   :  { %471 = vst [vmem:[#allocation2 + $0x8] sm:$0xff] %v467_v28 }
 0x171   :  { %v520_v29 = vpop.eup %519 }
 0x172   :  { %v469_v30 = vmul.f32 0.6931472, %v520_v29 }
 0x174   :  { %472 = vst [vmem:[#allocation2 + $0x10] sm:$0xff] %v469_v30 }
 0x175   :  { %485 = dma.vmem_to_hbm [thread:$0]  %s478_s20, 384, %s480_s22, [#allocation3], %s548_s23, %s548_s23, %s549_s24  }
 0x176   :  { %545 = dma.done.wait [#allocation3], 384  }
 0x177   :  { %546 = vsyncadd [#allocation3], 4294966912 }
 0x178   :  { %490 = vsyncpa [#allocation3], 1 }

</bundles_post_ra>
